<compile_context>
chip_gen: v6e
topology: v6e:2x2x1
jax: 0.10.0
libtpu: 0.0.40
codegen_flags: <defaults>
</compile_context>

<pallas_src>
import jax
import jax.numpy as jnp
from jax.experimental import pallas as pl
from jax.experimental.pallas import tpu as pltpu

LANE = 128
HIDDEN = 128


def _next_pow2(n):
    p = 1
    while p < n:
        p *= 2
    return p


def policy_kernel(x_ref, w1_ref, b1_ref, w2_ref, b2_ref, w3_ref, b3_ref,
                  mask_ref, out_ref):
    # x_ref:   (Gt*B, in_dims) f32  -- Gt independent softmax groups, flattened.
    # w*_ref:  bf16 [in, out] (resident across the grid), b*_ref: f32 (1, out).
    # w3_ref:  (128, 128) bf16, fc3 weights tiled across lane-blocks of d_pad.
    # mask_ref:(Gt, 1, 128) f32, mask[g, 0, c] = 1 iff lane c belongs to group g.
    # out_ref: (B, 128) f32 lane-packed probabilities:
    #          out[b, g*d_pad + d] = softmax(fc3(h2), dim=0)[g, b, d].
    B, lanes = out_ref.shape
    Gt = mask_ref.shape[0]

    x = x_ref[...].astype(jnp.bfloat16)  # in-kernel cast; VPU has slack

    h1 = jnp.dot(x, w1_ref[...], preferred_element_type=jnp.float32) + b1_ref[...]
    h1 = jnp.maximum(h1, 0.0).astype(jnp.bfloat16)

    h2 = jnp.dot(h1, w2_ref[...], preferred_element_type=jnp.float32) + b2_ref[...]
    h2 = jnp.maximum(h2, 0.0).astype(jnp.bfloat16)

    # fc3 against the lane-tiled weights: each group's 4 real logits are
    # replicated across all 32 lane-blocks of its rows.
    logits = jnp.dot(h2, w3_ref[...], preferred_element_type=jnp.float32) + b3_ref[...]

    # Split rows back into (group, batch) and select, per lane, the lane-block
    # that belongs to that lane's group -> one dense (B, 128) slab where lane
    # c holds column (c % d_pad) of group (c // d_pad). Pure VPU mul+add over
    # Gt vregs; no cross-lane shuffles.
    logits = logits.reshape(Gt, B, lanes)
    packed = jnp.sum(logits * mask_ref[...], axis=0)  # (B, 128)

    # softmax over dim=0 (the batch rows), per lane == per (group, action)
    # column, exactly as F.softmax(fc3(x), dim=0). Exact normalization.
    m = jnp.max(packed, axis=0, keepdims=True)
    e = jnp.exp(packed - m)
    denom = jnp.sum(e, axis=0, keepdims=True)
    out_ref[...] = (e / denom).astype(out_ref.dtype)


def prepare_params(params):
    """One-time preprocessing (hoisted out of the per-call hot path).

    Casts weights to bf16, tiles fc3 across the 128 lanes and builds the
    lane->group pack mask. Returns a dict consumed by the forward functions.
    """
    w1, b1, w2, b2, w3, b3 = params
    in_dims = w1.shape[0]
    out_dims = w3.shape[1]
    assert w1.shape[1] == HIDDEN and w2.shape == (HIDDEN, HIDDEN)
    assert w3.shape[0] == HIDDEN
    # TODO(synk): output_dims > 128 would need a tiled-N output path.
    assert out_dims <= LANE, "output_dims > 128 not supported by this kernel"

    d_pad = _next_pow2(out_dims)          # lane-block width per group (divides 128)
    groups_per_step = LANE // d_pad       # Gt groups packed into one 128-lane slab

    w3_pad = jnp.zeros((HIDDEN, d_pad), jnp.float32).at[:, :out_dims].set(w3)
    b3_pad = jnp.zeros((d_pad,), jnp.float32).at[:out_dims].set(b3.reshape(-1))
    w3_tiled = jnp.tile(w3_pad, (1, groups_per_step)).astype(jnp.bfloat16)   # (128,128)
    b3_tiled = jnp.tile(b3_pad, (groups_per_step,)).reshape(1, LANE)         # (1,128) f32

    lane_group = jnp.arange(LANE) // d_pad
    mask = (lane_group[None, :] == jnp.arange(groups_per_step)[:, None])
    mask = mask.astype(jnp.float32).reshape(groups_per_step, 1, LANE)

    return dict(
        w1=w1.astype(jnp.bfloat16),
        b1=b1.reshape(1, HIDDEN).astype(jnp.float32),
        w2=w2.astype(jnp.bfloat16),
        b2=b2.reshape(1, HIDDEN).astype(jnp.float32),
        w3=w3_tiled,
        b3=b3_tiled,
        mask=mask,
        in_dims=in_dims,
        out_dims=out_dims,
        d_pad=d_pad,
        groups_per_step=groups_per_step,
    )


def policy_net_forward_batched(xs, kp):
    """xs: [G, B, input_dims] f32 -- G independent forward passes.

    Softmax over dim=0 is taken within each group of B rows (identical to
    calling the PyTorch module G times). Returns [G, B, output_dims] f32.
    """
    G, B, in_dims = xs.shape
    assert in_dims == kp["in_dims"]
    Gt = kp["groups_per_step"]
    d_pad = kp["d_pad"]
    out_dims = kp["out_dims"]

    n_steps = pl.cdiv(G, Gt)
    g_pad = n_steps * Gt
    if g_pad != G:
        # Zero-padded groups produce a harmless uniform softmax; sliced off below.
        xs = jnp.concatenate(
            [xs, jnp.zeros((g_pad - G, B, in_dims), xs.dtype)], axis=0)
    # Row-major flatten so each grid step sees one contiguous (Gt*B, in) block.
    x2d = xs.reshape(g_pad * B, in_dims)

    # Constant index_maps -> weights/biases/mask are DMA'd once and stay
    # resident in VMEM across all grid steps.
    const = lambda a: pl.BlockSpec(a.shape, lambda s, _n=None, _a=a: (0,) * a.ndim)

    out = pl.pallas_call(
        policy_kernel,
        out_shape=jax.ShapeDtypeStruct((n_steps, B, LANE), jnp.float32),
        grid=(n_steps,),
        in_specs=[
            pl.BlockSpec((Gt * B, in_dims), lambda s: (s, 0)),
            const(kp["w1"]), const(kp["b1"]),
            const(kp["w2"]), const(kp["b2"]),
            const(kp["w3"]), const(kp["b3"]),
            const(kp["mask"]),
        ],
        out_specs=pl.BlockSpec((None, B, LANE), lambda s: (s, 0, 0)),
        compiler_params=pltpu.CompilerParams(
            # Independent steps: let v7x's two TensorCores split the grid.
            dimension_semantics=("parallel",),
        ),
    )(x2d, kp["w1"], kp["b1"], kp["w2"], kp["b2"], kp["w3"], kp["b3"], kp["mask"])

    # Unpack the lane-packed slab: out[s, b, g*d_pad + d] -> [s*Gt + g, b, d].
    # Tiny plain-JAX reshape/transpose over [steps, B, 128] (a few KB).
    out = out.reshape(n_steps, B, Gt, d_pad)
    out = jnp.transpose(out, (0, 2, 1, 3)).reshape(g_pad, B, d_pad)
    return out[:G, :, :out_dims]


def policy_net_forward(x, kp):
    """x: [B, input_dims] -- matches the PyTorch module's forward exactly."""
    return policy_net_forward_batched(x[None], kp)[0]


def init_params(key, input_dims, output_dims, hidden=HIDDEN):
    # Deterministic synthetic init (PyTorch-Linear-like uniform fan-in scaling).
    ks = jax.random.split(key, 6)

    def lin(kw, kb, fan_in, fan_out):
        bound = 1.0 / jnp.sqrt(fan_in)
        w = jax.random.uniform(kw, (fan_in, fan_out), jnp.float32, -bound, bound)
        b = jax.random.uniform(kb, (1, fan_out), jnp.float32, -bound, bound)
        return w, b

    w1, b1 = lin(ks[0], ks[1], input_dims, hidden)
    w2, b2 = lin(ks[2], ks[3], hidden, hidden)
    w3, b3 = lin(ks[4], ks[5], hidden, output_dims)
    return (w1, b1, w2, b2, w3, b3)


def reference_forward(x, params):
    # Mirrors the kernel's bf16-input / f32-accumulate matmuls so the
    # comparison is tight; softmax over dim=0 as in the PyTorch module.
    w1, b1, w2, b2, w3, b3 = params
    bf, f32 = jnp.bfloat16, jnp.float32
    h1 = jnp.maximum(
        jnp.dot(x.astype(bf), w1.astype(bf), preferred_element_type=f32) + b1, 0.0)
    h2 = jnp.maximum(
        jnp.dot(h1.astype(bf), w2.astype(bf), preferred_element_type=f32) + b2, 0.0)
    logits = jnp.dot(h2.astype(bf), w3.astype(bf), preferred_element_type=f32) + b3
    return jax.nn.softmax(logits, axis=0)


if __name__ == "__main__":
    key = jax.random.PRNGKey(0)
    k_x, k_p, k_r = jax.random.split(key, 3)

    B, input_dims, output_dims = 8, 32, 4
    params = init_params(k_p, input_dims, output_dims)
    kparams = prepare_params(params)   # one-time: bf16 cast + fc3 lane-tiling + mask

    # Single forward pass (module-equivalent call).
    x = jax.random.normal(k_x, (B, input_dims), jnp.float32)
    out = jax.block_until_ready(policy_net_forward(x, kparams))
    ref = reference_forward(x, params)
    assert out.shape == (B, output_dims)
    assert jnp.allclose(out, ref, atol=1e-2, rtol=1e-2), "mismatch vs reference"
    # Exact normalization in the kernel epilogue: columns sum to 1 tightly.
    assert jnp.allclose(jnp.sum(out, axis=0), jnp.ones((output_dims,)), atol=1e-4)

    # Rollout-style batched call: 64 independent passes -> 2 "parallel" grid
    # steps of Gt=32 groups each (M = 256 rows per MXU pass), weights DMA'd
    # once and held resident in VMEM across the grid.
    G = 64
    xs = jax.random.normal(k_r, (G, B, input_dims), jnp.float32)
    outs = jax.block_until_ready(policy_net_forward_batched(xs, kparams))
    assert outs.shape == (G, B, output_dims)
    for g in (0, 3, 33, 63):
        refg = reference_forward(xs[g], params)
        assert jnp.allclose(outs[g], refg, atol=1e-2, rtol=1e-2), f"batched mismatch at group {g}"

    print("KERNEL_OK")
</pallas_src>

<mosaic_0001>
module attributes {stable_mosaic.version = 11 : i64} {
  func.func @policy_kernel(%arg0: i32, %arg1: memref<256x32xf32, #tpu.memory_space<vmem>>, %arg2: memref<32x128xbf16, #tpu.memory_space<vmem>>, %arg3: memref<1x128xf32, #tpu.memory_space<vmem>>, %arg4: memref<128x128xbf16, #tpu.memory_space<vmem>>, %arg5: memref<1x128xf32, #tpu.memory_space<vmem>>, %arg6: memref<128x128xbf16, #tpu.memory_space<vmem>>, %arg7: memref<1x128xf32, #tpu.memory_space<vmem>>, %arg8: memref<32x1x128xf32, #tpu.memory_space<vmem>>, %arg9: memref<1x8x128xf32, #tpu.memory_space<vmem>>) attributes {dimension_semantics = [#tpu.dimension_semantics<parallel>], iteration_bounds = array<i64: 1>, scalar_prefetch = 0 : i64, scratch_operands = 0 : i64, tpu.core_type = #tpu.core_type<tc>, window_params = [{transform_indices = @transform_0, window_bounds = array<i64: 256, 32>}, {pipeline_mode = #tpu.pipeline_mode<synchronous>, transform_indices = @transform_1, window_bounds = array<i64: 32, 128>}, {pipeline_mode = #tpu.pipeline_mode<synchronous>, transform_indices = @transform_2, window_bounds = array<i64: 1, 128>}, {pipeline_mode = #tpu.pipeline_mode<synchronous>, transform_indices = @transform_3, window_bounds = array<i64: 128, 128>}, {pipeline_mode = #tpu.pipeline_mode<synchronous>, transform_indices = @transform_4, window_bounds = array<i64: 1, 128>}, {pipeline_mode = #tpu.pipeline_mode<synchronous>, transform_indices = @transform_5, window_bounds = array<i64: 128, 128>}, {pipeline_mode = #tpu.pipeline_mode<synchronous>, transform_indices = @transform_6, window_bounds = array<i64: 1, 128>}, {pipeline_mode = #tpu.pipeline_mode<synchronous>, transform_indices = @transform_7, window_bounds = array<i64: 32, 1, 128>}, {transform_indices = @transform_8, window_bounds = array<i64: 1, 8, 128>}]} {
    %c0 = arith.constant 0 : index
    %c0_0 = arith.constant 0 : index
    %0 = vector.load %arg1[%c0, %c0_0] : memref<256x32xf32, #tpu.memory_space<vmem>>, vector<256x32xf32>
    %1 = arith.truncf %0 : vector<256x32xf32> to vector<256x32xbf16>
    %c0_1 = arith.constant 0 : index
    %c0_2 = arith.constant 0 : index
    %2 = vector.load %arg2[%c0_1, %c0_2] : memref<32x128xbf16, #tpu.memory_space<vmem>>, vector<32x128xbf16>
    %cst = arith.constant dense<0.000000e+00> : vector<256x128xf32>
    %3 = tpu.matmul %1, %2, %cst {dimension_numbers = #tpu.dot_dimension_numbers<[1], [0], [0], [1], [0, 0, 1, 1], [], []>} : vector<256x32xbf16>, vector<32x128xbf16>, vector<256x128xf32> -> vector<256x128xf32>
    %c0_3 = arith.constant 0 : index
    %c0_4 = arith.constant 0 : index
    %4 = vector.load %arg3[%c0_3, %c0_4] : memref<1x128xf32, #tpu.memory_space<vmem>>, vector<1x128xf32>
    %5 = vector.broadcast %4 : vector<1x128xf32> to vector<256x128xf32>
    %6 = arith.addf %3, %5 : vector<256x128xf32>
    %cst_5 = arith.constant 0.000000e+00 : f32
    %7 = vector.broadcast %cst_5 : f32 to vector<256x128xf32>
    %8 = arith.maximumf %6, %7 : vector<256x128xf32>
    %9 = arith.truncf %8 : vector<256x128xf32> to vector<256x128xbf16>
    %c0_6 = arith.constant 0 : index
    %c0_7 = arith.constant 0 : index
    %10 = vector.load %arg4[%c0_6, %c0_7] : memref<128x128xbf16, #tpu.memory_space<vmem>>, vector<128x128xbf16>
    %cst_8 = arith.constant dense<0.000000e+00> : vector<256x128xf32>
    %11 = tpu.matmul %9, %10, %cst_8 {dimension_numbers = #tpu.dot_dimension_numbers<[1], [0], [0], [1], [0, 0, 1, 1], [], []>} : vector<256x128xbf16>, vector<128x128xbf16>, vector<256x128xf32> -> vector<256x128xf32>
    %c0_9 = arith.constant 0 : index
    %c0_10 = arith.constant 0 : index
    %12 = vector.load %arg5[%c0_9, %c0_10] : memref<1x128xf32, #tpu.memory_space<vmem>>, vector<1x128xf32>
    %13 = vector.broadcast %12 : vector<1x128xf32> to vector<256x128xf32>
    %14 = arith.addf %11, %13 : vector<256x128xf32>
    %cst_11 = arith.constant 0.000000e+00 : f32
    %15 = vector.broadcast %cst_11 : f32 to vector<256x128xf32>
    %16 = arith.maximumf %14, %15 : vector<256x128xf32>
    %17 = arith.truncf %16 : vector<256x128xf32> to vector<256x128xbf16>
    %c0_12 = arith.constant 0 : index
    %c0_13 = arith.constant 0 : index
    %18 = vector.load %arg6[%c0_12, %c0_13] : memref<128x128xbf16, #tpu.memory_space<vmem>>, vector<128x128xbf16>
    %cst_14 = arith.constant dense<0.000000e+00> : vector<256x128xf32>
    %19 = tpu.matmul %17, %18, %cst_14 {dimension_numbers = #tpu.dot_dimension_numbers<[1], [0], [0], [1], [0, 0, 1, 1], [], []>} : vector<256x128xbf16>, vector<128x128xbf16>, vector<256x128xf32> -> vector<256x128xf32>
    %c0_15 = arith.constant 0 : index
    %c0_16 = arith.constant 0 : index
    %20 = vector.load %arg7[%c0_15, %c0_16] : memref<1x128xf32, #tpu.memory_space<vmem>>, vector<1x128xf32>
    %21 = vector.broadcast %20 : vector<1x128xf32> to vector<256x128xf32>
    %22 = arith.addf %19, %21 : vector<256x128xf32>
    %23 = vector.shape_cast %22 : vector<256x128xf32> to vector<32x8x128xf32>
    %c0_17 = arith.constant 0 : index
    %c0_18 = arith.constant 0 : index
    %c0_19 = arith.constant 0 : index
    %24 = vector.load %arg8[%c0_17, %c0_18, %c0_19] : memref<32x1x128xf32, #tpu.memory_space<vmem>>, vector<32x1x128xf32>
    %25 = vector.broadcast %24 : vector<32x1x128xf32> to vector<32x8x128xf32>
    %26 = arith.mulf %23, %25 : vector<32x8x128xf32>
    %cst_20 = arith.constant dense<0.000000e+00> : vector<8x128xf32>
    %27 = vector.multi_reduction <add>, %26, %cst_20 [0] : vector<32x8x128xf32> to vector<8x128xf32>
    %cst_21 = arith.constant dense<0xFF800000> : vector<128xf32>
    %28 = vector.multi_reduction <maximumf>, %27, %cst_21 [0] : vector<8x128xf32> to vector<128xf32>
    %29 = vector.shape_cast %28 : vector<128xf32> to vector<1x128xf32>
    %30 = vector.broadcast %29 : vector<1x128xf32> to vector<8x128xf32>
    %31 = arith.subf %27, %30 : vector<8x128xf32>
    %32 = math.exp %31 : vector<8x128xf32>
    %cst_22 = arith.constant dense<0.000000e+00> : vector<128xf32>
    %33 = vector.multi_reduction <add>, %32, %cst_22 [0] : vector<8x128xf32> to vector<128xf32>
    %34 = vector.shape_cast %33 : vector<128xf32> to vector<1x128xf32>
    %35 = vector.broadcast %34 : vector<1x128xf32> to vector<8x128xf32>
    %36 = arith.divf %32, %35 : vector<8x128xf32>
    %c0_23 = arith.constant 0 : index
    %c0_24 = arith.constant 0 : index
    %c0_25 = arith.constant 0 : index
    %37 = vector.load %arg9[%c0_23, %c0_24, %c0_25] : memref<1x8x128xf32, #tpu.memory_space<vmem>>, vector<1x8x128xf32>
    %38 = vector.shape_cast %37 : vector<1x8x128xf32> to vector<8x128xf32>
    %39 = vector.shape_cast %36 : vector<8x128xf32> to vector<1x8x128xf32>
    tpu.vector_store %arg9[%c0_23, %c0_24, %c0_25], %39 {strides = array<i32>} : memref<1x8x128xf32, #tpu.memory_space<vmem>>, vector<1x8x128xf32>,
    return
  }
  func.func @transform_0(%arg0: i32) -> (i32, i32) {
    %c0_i32 = arith.constant 0 : i32
    %c0_i32_0 = arith.constant 0 : i32
    return %arg0, %c0_i32 : i32, i32
  }
  func.func @transform_1(%arg0: i32) -> (i32, i32) {
    %c0_i32 = arith.constant 0 : i32
    %c0_i32_0 = arith.constant 0 : i32
    %c0_i32_1 = arith.constant 0 : i32
    return %c0_i32, %c0_i32_0 : i32, i32
  }
  func.func @transform_2(%arg0: i32) -> (i32, i32) {
    %c0_i32 = arith.constant 0 : i32
    %c0_i32_0 = arith.constant 0 : i32
    %c0_i32_1 = arith.constant 0 : i32
    return %c0_i32, %c0_i32_0 : i32, i32
  }
  func.func @transform_3(%arg0: i32) -> (i32, i32) {
    %c0_i32 = arith.constant 0 : i32
    %c0_i32_0 = arith.constant 0 : i32
    %c0_i32_1 = arith.constant 0 : i32
    return %c0_i32, %c0_i32_0 : i32, i32
  }
  func.func @transform_4(%arg0: i32) -> (i32, i32) {
    %c0_i32 = arith.constant 0 : i32
    %c0_i32_0 = arith.constant 0 : i32
    %c0_i32_1 = arith.constant 0 : i32
    return %c0_i32, %c0_i32_0 : i32, i32
  }
  func.func @transform_5(%arg0: i32) -> (i32, i32) {
    %c0_i32 = arith.constant 0 : i32
    %c0_i32_0 = arith.constant 0 : i32
    %c0_i32_1 = arith.constant 0 : i32
    return %c0_i32, %c0_i32_0 : i32, i32
  }
  func.func @transform_6(%arg0: i32) -> (i32, i32) {
    %c0_i32 = arith.constant 0 : i32
    %c0_i32_0 = arith.constant 0 : i32
    %c0_i32_1 = arith.constant 0 : i32
    return %c0_i32, %c0_i32_0 : i32, i32
  }
  func.func @transform_7(%arg0: i32) -> (i32, i32, i32) {
    %c0_i32 = arith.constant 0 : i32
    %c0_i32_0 = arith.constant 0 : i32
    %c0_i32_1 = arith.constant 0 : i32
    %c0_i32_2 = arith.constant 0 : i32
    return %c0_i32, %c0_i32_0, %c0_i32_1 : i32, i32, i32
  }
  func.func @transform_8(%arg0: i32) -> (i32, i32, i32) {
    %c0_i32 = arith.constant 0 : i32
    %c0_i32_0 = arith.constant 0 : i32
    %c0_i32_1 = arith.constant 0 : i32
    return %arg0, %c0_i32, %c0_i32_0 : i32, i32, i32
  }
}

</mosaic_0001>

<bundles_post_ra>
// kernel: tpu_custom_call.1
= control target key start
LH: loop header
LB: loop body
LE: loop exit
PB: predicated region body
PF: predicated region fallthrough
CT: control target
= control target key end

     0   :  { %vm102_vm0 = vcmask 261120   ;;  %s1944_s0 = inlined_call_operand.vmem [shape: f32[256,32], index: 0, kind: input, shape index: {}]   ;;  %s1945_s1 = inlined_call_operand.vmem [shape: bf16[32,128], index: 1, kind: input, shape index: {}]   ;;  %s1946_s2 = inlined_call_operand.vmem [shape: f32[1,128], index: 2, kind: input, shape index: {}]   ;;  %s1947_s3 = inlined_call_operand.vmem [shape: bf16[128,128], index: 3, kind: input, shape index: {}]   ;;  %s1948_s4 = inlined_call_operand.vmem [shape: f32[1,128], index: 4, kind: input, shape index: {}]   ;;  %s1949_s5 = inlined_call_operand.vmem [shape: bf16[128,128], index: 5, kind: input, shape index: {}]   ;;  %s1950_s6 = inlined_call_operand.vmem [shape: f32[1,128], index: 6, kind: input, shape index: {}]   ;;  %s1951_s7 = inlined_call_operand.vmem [shape: f32[32,1,128], index: 7, kind: input, shape index: {}]   ;;  %s1952_s8 = inlined_call_operand.hbm [shape: f32[1,8,128], index: 8, kind: output, shape index: {}]  }
   0x1   :  { %v1463_v0 = vld [vmem:[%s1945_s1 + $0x8] sm:$0xff]   ;;  %v1464_v1 = vld [vmem:[%s1945_s1] sm:$0xff]   ;;  %v33_v5 = vld [vmem:[%s1944_s0 + $0x10] sm:$0xff] }
   0x2   :  { %1326 = vmatprep.subr.bf16.mxu0 %v1463_v0  ;;  %v31_v2 = vld [vmem:[%s1944_s0] sm:$0xff]  ;;  %v32_v3 = vld [vmem:[%s1944_s0 + $0x8] sm:$0xff]  ;;  %1458 = vmatprep.subr.bf16.mxu1 %v1463_v0  ;;  %v34_v6 = vld [vmem:[%s1944_s0 + $0x18] sm:$0xff] }
   0x3   :  { %1327 = vmatpush3.bf16.msra.mxu0 %v1463_v0  ;;  %v63_v4 = vpack.c.bf16 %v32_v3, %v31_v2  ;;  %1460 = vmatpush3.bf16.msra.mxu1 %v1463_v0  ;;  %v35_v7 = vld [vmem:[%s1944_s0 + $0x20] sm:$0xff]  ;;  %v36_v8 = vld [vmem:[%s1944_s0 + $0x28] sm:$0xff]  ;;  %v64_v9 = vpack.c.bf16 %v34_v6, %v33_v5  ;;  %v49_v14 = vld [vmem:[%s1944_s0 + $0x90] sm:$0xff] }
   0x4   :  { %1328 = vmatprep.subr.bf16.mxu0 %v1464_v1  ;;  %1459 = vmatprep.subr.bf16.mxu1 %v1464_v1  ;;  %v65_v10 = vpack.c.bf16 %v36_v8, %v35_v7  ;;  %v47_v11 = vld [vmem:[%s1944_s0 + $0x80] sm:$0xff]  ;;  %v48_v12 = vld [vmem:[%s1944_s0 + $0x88] sm:$0xff]  ;;  %v50_v15 = vld [vmem:[%s1944_s0 + $0x98] sm:$0xff] }
   0x5   :  { %1330 = vmatprep.mubr.msk.bf16.mxu0 %vm102_vm0, %v63_v4  ;;  %v71_v13 = vpack.c.bf16 %v48_v12, %v47_v11  ;;  %v51_v16 = vld [vmem:[%s1944_s0 + $0xa0] sm:$0xff]  ;;  %v72_v17 = vpack.c.bf16 %v50_v15, %v49_v14  ;;  %v52_v18 = vld [vmem:[%s1944_s0 + $0xa8] sm:$0xff]  ;;  %v37_v19 = vld [vmem:[%s1944_s0 + $0x30] sm:$0xff] }
   0x6   :  { %v38_v20 = vld [vmem:[%s1944_s0 + $0x38] sm:$0xff]  ;;  %v39_v21 = vld [vmem:[%s1944_s0 + $0x40] sm:$0xff]  ;;  %v73_v22 = vpack.c.bf16 %v52_v18, %v51_v16  ;;  %v40_v23 = vld [vmem:[%s1944_s0 + $0x48] sm:$0xff] }
   0x7   :  { %1329 = vmatpush3.bf16.msra.mxu0 %v1464_v1  ;;  %1461 = vmatpush3.bf16.msra.mxu1 %v1464_v1  ;;  %v53_v24 = vld [vmem:[%s1944_s0 + $0xb0] sm:$0xff]  ;;  %v54_v25 = vld [vmem:[%s1944_s0 + $0xb8] sm:$0xff]  ;;  %v55_v26 = vld [vmem:[%s1944_s0 + $0xc0] sm:$0xff]  ;;  %v66_v29 = vpack.c.bf16 %v38_v20, %v37_v19  ;;  %v67_v31 = vpack.c.bf16 %v40_v23, %v39_v21 }
   0x8   :  { %1346 = vmatprep.mubr.msk.bf16.mxu1 %vm102_vm0, %v71_v13  ;;  %v56_v27 = vld [vmem:[%s1944_s0 + $0xc8] sm:$0xff]  ;;  %v1465_v28 = vld [vmem:[%s1947_s3 + $0x38] sm:$0xff]   ;;  %v1466_v30 = vld [vmem:[%s1947_s3 + $0x30] sm:$0xff]   ;;  %v74_v32 = vpack.c.bf16 %v54_v25, %v53_v24 }
   0x9   :  { %1362 = vmatprep.subr.bf16.mxu1 %v1465_v28  ;;  %v75_v33 = vpack.c.bf16 %v56_v27, %v55_v26  ;;  %v41_v34 = vld [vmem:[%s1944_s0 + $0x50] sm:$0xff]  ;;  %v42_v35 = vld [vmem:[%s1944_s0 + $0x58] sm:$0xff]  ;;  %v1467_v36 = vld [vmem:[%s1947_s3 + $0x28] sm:$0xff]  }
   0xa   :  { %1331 = vmatmul.mubr.msk.bf16.vlgmr.msra.gmra.mxu0 %vm102_vm0, %v64_v9  ;;  %1347 = vmatmul.mubr.msk.bf16.vlgmr.msra.gmra.mxu1 %vm102_vm0, %v72_v17  ;;  %v43_v37 = vld [vmem:[%s1944_s0 + $0x60] sm:$0xff]  ;;  %v44_v38 = vld [vmem:[%s1944_s0 + $0x68] sm:$0xff]  ;;  %v57_v39 = vld [vmem:[%s1944_s0 + $0xd0] sm:$0xff]  ;;  %v68_v44 = vpack.c.bf16 %v42_v35, %v41_v34 }
   0xb   :  { %1334 = vmatprep.mubr.msk.bf16.mxu0 %vm102_vm0, %v65_v10  ;;  %1350 = vmatprep.mubr.msk.bf16.mxu1 %vm102_vm0, %v73_v22  ;;  %v58_v40 = vld [vmem:[%s1944_s0 + $0xd8] sm:$0xff]  ;;  %v59_v41 = vld [vmem:[%s1944_s0 + $0xe0] sm:$0xff]  ;;  %v60_v42 = vld [vmem:[%s1944_s0 + $0xe8] sm:$0xff]  ;;  %v69_v45 = vpack.c.bf16 %v44_v38, %v43_v37 }
   0xc   :  { %1363 = vmatpush3.bf16.msra.mxu1 %v1465_v28  ;;  %v1468_v43 = vld [vmem:[%s1947_s3 + $0x20] sm:$0xff]   ;;  %v76_v46 = vpack.c.bf16 %v58_v40, %v57_v39  ;;  %v77_v47 = vpack.c.bf16 %v60_v42, %v59_v41  ;;  %v1469_v48 = vld [vmem:[%s1947_s3 + $0x18] sm:$0xff]  }
   0xd   :  { %1364 = vmatprep.subr.bf16.mxu1 %v1466_v30 }
  0x10   :  { %1365 = vmatpush3.bf16.msra.mxu1 %v1466_v30 }
  0x11   :  { %1366 = vmatprep.subr.bf16.mxu1 %v1467_v36 }
  0x12   :  { %1335 = vmatmul.mubr.msk.bf16.gmra.mxu0 %vm102_vm0, %v66_v29  ;;  %1351 = vmatmul.mubr.msk.bf16.gmra.mxu1 %vm102_vm0, %v74_v32 }
  0x13   :  { %1338 = vmatprep.mubr.msk.bf16.mxu0 %vm102_vm0, %v67_v31  ;;  %1354 = vmatprep.mubr.msk.bf16.mxu1 %vm102_vm0, %v75_v33 }
  0x14   :  { %1367 = vmatpush3.bf16.msra.mxu1 %v1467_v36 }
  0x15   :  { %1368 = vmatprep.subr.bf16.mxu1 %v1468_v43 }
  0x16   :  { %13 = vsyncpa [#allocation3], 0  ;;  %v45_v49 = vld [vmem:[%s1944_s0 + $0x70] sm:$0xff]  ;;  %v46_v50 = vld [vmem:[%s1944_s0 + $0x78] sm:$0xff] }
  0x17   :  { %v61_v51 = vld [vmem:[%s1944_s0 + $0xf0] sm:$0xff]  ;;  %v62_v52 = vld [vmem:[%s1944_s0 + $0xf8] sm:$0xff]  ;;  %v70_v53 = vpack.c.bf16 %v46_v50, %v45_v49  ;;  %v1471_v56 = vld [vmem:[%s1947_s3 + $0x8] sm:$0xff]  }
  0x18   :  { %1369 = vmatpush3.bf16.msra.mxu1 %v1468_v43  ;;  %v78_v54 = vpack.c.bf16 %v62_v52, %v61_v51  ;;  %v1470_v55 = vld [vmem:[%s1947_s3 + $0x10] sm:$0xff]   ;;  %v1472_v57 = vld [vmem:[%s1947_s3] sm:$0xff]   ;;  %v1473_v58 = vld [vmem:[%s1949_s5 + $0x38] sm:$0xff]  }
  0x19   :  { %1370 = vmatprep.subr.bf16.mxu1 %v1469_v48  ;;  %v1474_v59 = vld [vmem:[%s1949_s5 + $0x30] sm:$0xff]   ;;  %1410 = vmatprep.subr.bf16.mxu0 %v1473_v58  ;;  %v1475_v60 = vld [vmem:[%s1949_s5 + $0x28] sm:$0xff]   ;;  %v1476_v61 = vld [vmem:[%s1949_s5 + $0x20] sm:$0xff]  }
  0x1a   :  { %1339 = vmatmul.mubr.msk.bf16.gmra.mxu0 %vm102_vm0, %v68_v44  ;;  %1355 = vmatmul.mubr.msk.bf16.gmra.mxu1 %vm102_vm0, %v76_v46  ;;  %v1477_v62 = vld [vmem:[%s1949_s5 + $0x18] sm:$0xff]   ;;  %v1715_v2 = vld [vmem:[%s1946_s2] ss:$0 sm:$0xff] }
  0x1b   :  { %1342 = vmatprep.mubr.msk.bf16.mxu0 %vm102_vm0, %v69_v45  ;;  %1358 = vmatprep.mubr.msk.bf16.mxu1 %vm102_vm0, %v77_v47 }
  0x1c   :  { %1371 = vmatpush3.bf16.msra.mxu1 %v1469_v48  ;;  %1411 = vmatpush3.bf16.msra.mxu0 %v1473_v58 }
  0x1d   :  { %1372 = vmatprep.subr.bf16.mxu1 %v1470_v55  ;;  %1412 = vmatprep.subr.bf16.mxu0 %v1474_v59 }
  0x20   :  { %1373 = vmatpush3.bf16.msra.mxu1 %v1470_v55  ;;  %1413 = vmatpush3.bf16.msra.mxu0 %v1474_v59 }
  0x21   :  { %1374 = vmatprep.subr.bf16.mxu1 %v1471_v56  ;;  %1414 = vmatprep.subr.bf16.mxu0 %v1475_v60 }
  0x22   :  { %1343 = vmatmul.mubr.msk.bf16.gmra.mxu0 %vm102_vm0, %v70_v53  ;;  %1359 = vmatmul.mubr.msk.bf16.gmra.mxu1 %vm102_vm0, %v78_v54 }
  0x24   :  { %1375 = vmatpush3.bf16.msra.mxu1 %v1471_v56  ;;  %1415 = vmatpush3.bf16.msra.mxu0 %v1475_v60 }
  0x25   :  { %1376 = vmatprep.subr.bf16.mxu1 %v1472_v57  ;;  %1416 = vmatprep.subr.bf16.mxu0 %v1476_v61 }
  0x28   :  { %1377 = vmatpush3.bf16.msra.mxu1 %v1472_v57  ;;  %1417 = vmatpush3.bf16.msra.mxu0 %v1476_v61 }
  0x29   :  { %1418 = vmatprep.subr.bf16.mxu0 %v1477_v62 }
  0x2c   :  { %1419 = vmatpush3.bf16.msra.mxu0 %v1477_v62 }
  0xca   :  { %v1332_v63 = vpop.f32.mrf.mxu0  ;;  %v1710_v0 = vpop.f32.mrf.mxu1 }
  0xcb   :  { %v194_v8 = vadd.f32 %v1332_v63, %v1715_v2 }
  0xcc   :  { %v185_v1 = vpop.f32.mrf.mxu0  ;;  %v249_v3 = vpop.f32.mrf.mxu1 }
  0xcd   :  { %v186_v5 = vadd.f32 %v1715_v2, %v185_v1  ;;  %v314_v17 = vmax.f32 %v194_v8, 0.0  ;;  %v250_v53 = vadd.f32 %v1715_v2, %v249_v3 }
  0xce   :  { %v1333_v4 = vpop.f32.mrf.mxu0  ;;  %v1719_v7 = vpop.f32.mrf.mxu1 }
  0xcf   :  { %v197_v6 = vadd.f32 %v1333_v4, %v1715_v2  ;;  %v312_v14 = vmax.f32 %v186_v5, 0.0  ;;  %v328_v62 = vmax.f32 %v250_v53, 0.0  ;;  %v1774_v53 = vld [vmem:[%s1948_s4] ss:$0 sm:$0xff] }
  0xd0   :  { %v188_v9 = vpop.f32.mrf.mxu0  ;;  %v252_v11 = vpop.f32.mrf.mxu1 }
  0xd1   :  { %v189_v10 = vadd.f32 %v1715_v2, %v188_v9  ;;  %v315_v12 = vmax.f32 %v197_v6, 0.0  ;;  %v253_v54 = vadd.f32 %v1715_v2, %v252_v11 }
  0xd2   :  { %v1336_v13 = vpop.f32.mrf.mxu0  ;;  %v1723_v16 = vpop.f32.mrf.mxu1 }
  0xd3   :  { %v313_v15 = vmax.f32 %v189_v10, 0.0  ;;  %v345_v21 = vpack.c.bf16 %v315_v12, %v314_v17  ;;  %v210_v26 = vadd.f32 %v1336_v13, %v1715_v2  ;;  %v329_v1 = vmax.f32 %v253_v54, 0.0 }
  0xd4   :  { %v201_v18 = vpop.f32.mrf.mxu0  ;;  %v265_v20 = vpop.f32.mrf.mxu1  ;;  %v258_v13 = vadd.f32 %v1710_v0, %v1715_v2  ;;  %v274_v0 = vadd.f32 %v1723_v16, %v1715_v2 }
  0xd5   :  { %v344_v19 = vpack.c.bf16 %v313_v15, %v312_v14  ;;  %v202_v23 = vadd.f32 %v1715_v2, %v201_v18  ;;  %v318_v34 = vmax.f32 %v210_v26, 0.0  ;;  %v352_v10 = vpack.c.bf16 %v329_v1, %v328_v62 }
  0xd6   :  { %v1337_v22 = vpop.f32.mrf.mxu0  ;;  %v1727_v25 = vpop.f32.mrf.mxu1  ;;  %v266_v11 = vadd.f32 %v1715_v2, %v265_v20  ;;  %v261_v15 = vadd.f32 %v1719_v7, %v1715_v2 }
  0xd7   :  { %v213_v24 = vadd.f32 %v1337_v22, %v1715_v2  ;;  %1378 = vmatprep.mubr.bf16.mxu1 %v344_v19  ;;  %v316_v32 = vmax.f32 %v202_v23, 0.0  ;;  %v277_v7 = vadd.f32 %v1727_v25, %v1715_v2 }
  0xd8   :  { %v204_v27 = vpop.f32.mrf.mxu0  ;;  %1379 = vmatmul.mubr.bf16.vlgmr.msra.gmra.mxu1 %v345_v21  ;;  %v268_v31 = vpop.f32.mrf.mxu1  ;;  %v332_v18 = vmax.f32 %v266_v11, 0.0  ;;  %v330_v21 = vmax.f32 %v258_v13, 0.0  ;;  %v331_v22 = vmax.f32 %v261_v15, 0.0 }
  0xd9   :  { %v205_v28 = vadd.f32 %v1715_v2, %v204_v27  ;;  %v319_v29 = vmax.f32 %v213_v24, 0.0  ;;  %v269_v12 = vadd.f32 %v1715_v2, %v268_v31  ;;  %v334_v31 = vmax.f32 %v274_v0, 0.0 }
  0xda   :  { %v1340_v30 = vpop.f32.mrf.mxu0  ;;  %v1731_v39 = vpop.f32.mrf.mxu1  ;;  %v353_v27 = vpack.c.bf16 %v331_v22, %v330_v21 }
  0xdb   :  { %v317_v33 = vmax.f32 %v205_v28, 0.0  ;;  %v347_v37 = vpack.c.bf16 %v319_v29, %v318_v34  ;;  %v226_v42 = vadd.f32 %v1340_v30, %v1715_v2  ;;  %v333_v19 = vmax.f32 %v269_v12, 0.0 }
  0xdc   :  { %v217_v35 = vpop.f32.mrf.mxu0  ;;  %v281_v47 = vpop.f32.mrf.mxu1  ;;  %v290_v16 = vadd.f32 %v1731_v39, %v1715_v2  ;;  %v1478_v39 = vld [vmem:[%s1949_s5 + $0x10] sm:$0xff]  }
  0xdd   :  { %v346_v36 = vpack.c.bf16 %v317_v33, %v316_v32  ;;  %v218_v40 = vadd.f32 %v1715_v2, %v217_v35  ;;  %v322_v50 = vmax.f32 %v226_v42, 0.0  ;;  %v354_v24 = vpack.c.bf16 %v333_v19, %v332_v18  ;;  %1420 = vmatprep.subr.bf16.mxu0 %v1478_v39 }
  0xde   :  { %v1341_v38 = vpop.f32.mrf.mxu0  ;;  %v1357_v57 = vpop.f32.mrf.mxu1  ;;  %v282_v20 = vadd.f32 %v1715_v2, %v281_v47  ;;  %v335_v32 = vmax.f32 %v277_v7, 0.0  ;;  %1421 = vmatpush3.bf16.msra.mxu0 %v1478_v39 }
  0xdf   :  { %v229_v41 = vadd.f32 %v1341_v38, %v1715_v2  ;;  %1382 = vmatprep.mubr.bf16.mxu1 %v346_v36  ;;  %v320_v48 = vmax.f32 %v218_v40, 0.0  ;;  %v293_v38 = vadd.f32 %v1357_v57, %v1715_v2 }
  0xe0   :  { %v220_v43 = vpop.f32.mrf.mxu0  ;;  %1383 = vmatmul.mubr.bf16.gmra.mxu1 %v347_v37  ;;  %v284_v3 = vpop.f32.mrf.mxu1  ;;  %v336_v29 = vmax.f32 %v282_v20, 0.0  ;;  %v355_v37 = vpack.c.bf16 %v335_v32, %v334_v31 }
  0xe1   :  { %v221_v44 = vadd.f32 %v1715_v2, %v220_v43  ;;  %v323_v45 = vmax.f32 %v229_v41, 0.0  ;;  %v285_v26 = vadd.f32 %v1715_v2, %v284_v3  ;;  %v338_v41 = vmax.f32 %v290_v16, 0.0 }
  0xe2   :  { %v1344_v46 = vpop.f32.mrf.mxu0  ;;  %v1360_v17 = vpop.f32.mrf.mxu1  ;;  %v339_v42 = vmax.f32 %v293_v38, 0.0 }
  0xe3   :  { %v321_v49 = vmax.f32 %v221_v44, 0.0  ;;  %v349_v55 = vpack.c.bf16 %v323_v45, %v322_v50  ;;  %v242_v60 = vadd.f32 %v1344_v46, %v1715_v2  ;;  %v337_v30 = vmax.f32 %v285_v26, 0.0  ;;  %v1479_v50 = vld [vmem:[%s1949_s5 + $0x8] sm:$0xff]  }
  0xe4   :  { %v233_v51 = vpop.f32.mrf.mxu0  ;;  %v297_v23 = vpop.f32.mrf.mxu1  ;;  %v357_v44 = vpack.c.bf16 %v339_v42, %v338_v41  ;;  %v306_v45 = vadd.f32 %v1360_v17, %v1715_v2  ;;  %1422 = vmatprep.subr.bf16.mxu0 %v1479_v50 }
  0xe5   :  { %v348_v52 = vpack.c.bf16 %v321_v49, %v320_v48  ;;  %v234_v58 = vadd.f32 %v1715_v2, %v233_v51  ;;  %v326_v8 = vmax.f32 %v242_v60, 0.0  ;;  %v356_v34 = vpack.c.bf16 %v337_v30, %v336_v29  ;;  %1423 = vmatpush3.bf16.msra.mxu0 %v1479_v50 }
  0xe6   :  { %v1345_v56 = vpop.f32.mrf.mxu0  ;;  %v1361_v28 = vpop.f32.mrf.mxu1  ;;  %v298_v35 = vadd.f32 %v1715_v2, %v297_v23  ;;  %v342_v47 = vmax.f32 %v306_v45, 0.0 }
  0xe7   :  { %v245_v59 = vadd.f32 %v1345_v56, %v1715_v2  ;;  %1386 = vmatprep.mubr.bf16.mxu1 %v348_v52  ;;  %v324_v5 = vmax.f32 %v234_v58, 0.0  ;;  %v309_v46 = vadd.f32 %v1361_v28, %v1715_v2 }
  0xe8   :  { %v236_v61 = vpop.f32.mrf.mxu0  ;;  %1387 = vmatmul.mubr.bf16.gmra.mxu1 %v349_v55  ;;  %v300_v33 = vpop.f32.mrf.mxu1  ;;  %v340_v25 = vmax.f32 %v298_v35, 0.0 }
  0xe9   :  { %v237_v63 = vadd.f32 %v1715_v2, %v236_v61  ;;  %v327_v4 = vmax.f32 %v245_v59, 0.0  ;;  %v301_v36 = vadd.f32 %v1715_v2, %v300_v33  ;;  %v343_v48 = vmax.f32 %v309_v46, 0.0  ;;  %v1480_v2 = vld [vmem:[%s1949_s5] sm:$0xff]  }
  0xea   :  { %1424 = vmatprep.subr.bf16.mxu0 %v1480_v2 }
  0xeb   :  { %v325_v6 = vmax.f32 %v237_v63, 0.0  ;;  %v351_v14 = vpack.c.bf16 %v327_v4, %v326_v8  ;;  %v341_v40 = vmax.f32 %v301_v36, 0.0  ;;  %v359_v49 = vpack.c.bf16 %v343_v48, %v342_v47  ;;  %1425 = vmatpush3.bf16.msra.mxu0 %v1480_v2 }
  0xed   :  { %v350_v9 = vpack.c.bf16 %v325_v6, %v324_v5  ;;  %v358_v43 = vpack.c.bf16 %v341_v40, %v340_v25 }
  0xef   :  { %1390 = vmatprep.mubr.bf16.mxu1 %v350_v9 }
  0xf0   :  { %1391 = vmatmul.mubr.bf16.gmra.mxu1 %v351_v14 }
  0xf1   :  { %1394 = vmatprep.mubr.bf16.mxu1 %v352_v10 }
  0xf8   :  { %1395 = vmatmul.mubr.bf16.gmra.mxu1 %v353_v27 }
  0xf9   :  { %1398 = vmatprep.mubr.bf16.mxu1 %v354_v24 }
 0x100   :  { %1399 = vmatmul.mubr.bf16.gmra.mxu1 %v355_v37 }
 0x101   :  { %1402 = vmatprep.mubr.bf16.mxu1 %v356_v34 }
 0x108   :  { %1403 = vmatmul.mubr.bf16.gmra.mxu1 %v357_v44 }
 0x109   :  { %1406 = vmatprep.mubr.bf16.mxu1 %v358_v43 }
 0x110   :  { %1407 = vmatmul.mubr.bf16.gmra.mxu1 %v359_v49 }
 0x198   :  { %v1380_v51 = vpop.f32.mrf.mxu1 }
 0x199   :  { %v474_v57 = vadd.f32 %v1380_v51, %v1774_v53 }
 0x19a   :  { %v465_v52 = vpop.f32.mrf.mxu1 }
 0x19b   :  { %v466_v55 = vadd.f32 %v1774_v53, %v465_v52  ;;  %v594_v1 = vmax.f32 %v474_v57, 0.0 }
 0x19c   :  { %v1381_v54 = vpop.f32.mrf.mxu1 }
 0x19d   :  { %v477_v56 = vadd.f32 %v1381_v54, %v1774_v53  ;;  %v592_v62 = vmax.f32 %v466_v55, 0.0 }
 0x19e   :  { %v468_v58 = vpop.f32.mrf.mxu1 }
 0x19f   :  { %v469_v59 = vadd.f32 %v1774_v53, %v468_v58  ;;  %v595_v60 = vmax.f32 %v477_v56, 0.0 }
 0x1a0   :  { %v1384_v61 = vpop.f32.mrf.mxu1 }
 0x1a1   :  { %v593_v63 = vmax.f32 %v469_v59, 0.0  ;;  %v625_v5 = vpack.c.bf16 %v595_v60, %v594_v1  ;;  %v490_v10 = vadd.f32 %v1384_v61, %v1774_v53 }
 0x1a2   :  { %v481_v4 = vpop.f32.mrf.mxu1 }
 0x1a3   :  { %v624_v3 = vpack.c.bf16 %v593_v63, %v592_v62  ;;  %v482_v8 = vadd.f32 %v1774_v53, %v481_v4  ;;  %v598_v18 = vmax.f32 %v490_v10, 0.0 }
 0x1a4   :  { %v1385_v6 = vpop.f32.mrf.mxu1 }
 0x1a5   :  { %v493_v9 = vadd.f32 %v1385_v6, %v1774_v53  ;;  %1426 = vmatprep.mubr.bf16.mxu0 %v624_v3  ;;  %v596_v15 = vmax.f32 %v482_v8, 0.0 }
 0x1a6   :  { %v484_v11 = vpop.f32.mrf.mxu1  ;;  %1427 = vmatmul.mubr.bf16.vlgmr.msra.gmra.mxu0 %v625_v5 }
 0x1a7   :  { %v485_v12 = vadd.f32 %v1774_v53, %v484_v11  ;;  %v599_v13 = vmax.f32 %v493_v9, 0.0 }
 0x1a8   :  { %v1388_v14 = vpop.f32.mrf.mxu1 }
 0x1a9   :  { %v597_v17 = vmax.f32 %v485_v12, 0.0  ;;  %v627_v22 = vpack.c.bf16 %v599_v13, %v598_v18  ;;  %v506_v26 = vadd.f32 %v1388_v14, %v1774_v53 }
 0x1aa   :  { %v497_v19 = vpop.f32.mrf.mxu1 }
 0x1ab   :  { %v626_v21 = vpack.c.bf16 %v597_v17, %v596_v15  ;;  %v498_v24 = vadd.f32 %v1774_v53, %v497_v19  ;;  %v602_v31 = vmax.f32 %v506_v26, 0.0 }
 0x1ac   :  { %v1389_v23 = vpop.f32.mrf.mxu1 }
 0x1ad   :  { %v509_v20 = vadd.f32 %v1389_v23, %v1774_v53  ;;  %1430 = vmatprep.mubr.bf16.mxu0 %v626_v21  ;;  %v600_v29 = vmax.f32 %v498_v24, 0.0 }
 0x1ae   :  { %v500_v27 = vpop.f32.mrf.mxu1  ;;  %1431 = vmatmul.mubr.bf16.gmra.mxu0 %v627_v22 }
 0x1af   :  { %v501_v0 = vadd.f32 %v1774_v53, %v500_v27  ;;  %v603_v7 = vmax.f32 %v509_v20, 0.0 }
 0x1b0   :  { %v1392_v28 = vpop.f32.mrf.mxu1 }
 0x1b1   :  { %v601_v30 = vmax.f32 %v501_v0, 0.0  ;;  %v629_v34 = vpack.c.bf16 %v603_v7, %v602_v31  ;;  %v522_v16 = vadd.f32 %v1392_v28, %v1774_v53 }
 0x1b2   :  { %v513_v32 = vpop.f32.mrf.mxu1 }
 0x1b3   :  { %v628_v33 = vpack.c.bf16 %v601_v30, %v600_v29  ;;  %v514_v36 = vadd.f32 %v1774_v53, %v513_v32  ;;  %v606_v44 = vmax.f32 %v522_v16, 0.0 }
 0x1b4   :  { %v1393_v35 = vpop.f32.mrf.mxu1 }
 0x1b5   :  { %v525_v37 = vadd.f32 %v1393_v35, %v1774_v53  ;;  %1434 = vmatprep.mubr.bf16.mxu0 %v628_v33  ;;  %v604_v42 = vmax.f32 %v514_v36, 0.0 }
 0x1b6   :  { %v516_v38 = vpop.f32.mrf.mxu1  ;;  %1435 = vmatmul.mubr.bf16.gmra.mxu0 %v629_v34 }
 0x1b7   :  { %v517_v25 = vadd.f32 %v1774_v53, %v516_v38  ;;  %v607_v40 = vmax.f32 %v525_v37, 0.0 }
 0x1b8   :  { %v1396_v41 = vpop.f32.mrf.mxu1 }
 0x1b9   :  { %v605_v43 = vmax.f32 %v517_v25, 0.0  ;;  %v631_v47 = vpack.c.bf16 %v607_v40, %v606_v44  ;;  %v538_v50 = vadd.f32 %v1396_v41, %v1774_v53  ;;  %v1811_v41 = vld [vmem:[%s1950_s6] ss:$0 sm:$0xff] }
 0x1ba   :  { %v529_v45 = vpop.f32.mrf.mxu1 }
 0x1bb   :  { %v630_v46 = vpack.c.bf16 %v605_v43, %v604_v42  ;;  %v530_v49 = vadd.f32 %v1774_v53, %v529_v45  ;;  %v610_v57 = vmax.f32 %v538_v50, 0.0  ;;  %v1229_v45 = vld [vmem:[%s1951_s7 + $0x1] ss:$0 sm:$0xff] }
 0x1bc   :  { %v1397_v48 = vpop.f32.mrf.mxu1 }
 0x1bd   :  { %v541_v39 = vadd.f32 %v1397_v48, %v1774_v53  ;;  %1438 = vmatprep.mubr.bf16.mxu0 %v630_v46  ;;  %v608_v55 = vmax.f32 %v530_v49, 0.0  ;;  %v1230_v48 = vld [vmem:[%s1951_s7 + $0x2] ss:$0 sm:$0xff] }
 0x1be   :  { %v532_v2 = vpop.f32.mrf.mxu1  ;;  %1439 = vmatmul.mubr.bf16.gmra.mxu0 %v631_v47 }
 0x1bf   :  { %v533_v51 = vadd.f32 %v1774_v53, %v532_v2  ;;  %v611_v52 = vmax.f32 %v541_v39, 0.0 }
 0x1c0   :  { %v1400_v54 = vpop.f32.mrf.mxu1 }
 0x1c1   :  { %v609_v56 = vmax.f32 %v533_v51, 0.0  ;;  %v633_v60 = vpack.c.bf16 %v611_v52, %v610_v57  ;;  %v554_v1 = vadd.f32 %v1400_v54, %v1774_v53  ;;  %v1231_v51 = vld [vmem:[%s1951_s7 + $0x3] ss:$0 sm:$0xff]  ;;  %v1232_v57 = vld [vmem:[%s1951_s7 + $0x4] ss:$0 sm:$0xff] }
 0x1c2   :  { %v545_v58 = vpop.f32.mrf.mxu1 }
 0x1c3   :  { %v632_v59 = vpack.c.bf16 %v609_v56, %v608_v55  ;;  %v546_v62 = vadd.f32 %v1774_v53, %v545_v58  ;;  %v614_v10 = vmax.f32 %v554_v1, 0.0 }
 0x1c4   :  { %v1401_v61 = vpop.f32.mrf.mxu1 }
 0x1c5   :  { %v557_v63 = vadd.f32 %v1401_v61, %v1774_v53  ;;  %1442 = vmatprep.mubr.bf16.mxu0 %v632_v59  ;;  %v612_v8 = vmax.f32 %v546_v62, 0.0  ;;  %v1233_v62 = vld [vmem:[%s1951_s7 + $0x5] ss:$0 sm:$0xff] }
 0x1c6   :  { %v548_v4 = vpop.f32.mrf.mxu1  ;;  %1443 = vmatmul.mubr.bf16.gmra.mxu0 %v633_v60 }
 0x1c7   :  { %v549_v3 = vadd.f32 %v1774_v53, %v548_v4  ;;  %v615_v5 = vmax.f32 %v557_v63, 0.0 }
 0x1c8   :  { %v1404_v6 = vpop.f32.mrf.mxu1 }
 0x1c9   :  { %v613_v9 = vmax.f32 %v549_v3, 0.0  ;;  %v635_v13 = vpack.c.bf16 %v615_v5, %v614_v10  ;;  %v570_v18 = vadd.f32 %v1404_v6, %v1774_v53  ;;  %v1234_v5 = vld [vmem:[%s1951_s7 + $0x6] ss:$0 sm:$0xff] }
 0x1ca   :  { %v561_v11 = vpop.f32.mrf.mxu1 }
 0x1cb   :  { %v634_v12 = vpack.c.bf16 %v613_v9, %v612_v8  ;;  %v562_v15 = vadd.f32 %v1774_v53, %v561_v11  ;;  %v618_v26 = vmax.f32 %v570_v18, 0.0  ;;  %v1235_v11 = vld [vmem:[%s1951_s7 + $0x7] ss:$0 sm:$0xff] }
 0x1cc   :  { %v1405_v14 = vpop.f32.mrf.mxu1 }
 0x1cd   :  { %v573_v17 = vadd.f32 %v1405_v14, %v1774_v53  ;;  %1446 = vmatprep.mubr.bf16.mxu0 %v634_v12  ;;  %v616_v24 = vmax.f32 %v562_v15, 0.0 }
 0x1ce   :  { %v564_v19 = vpop.f32.mrf.mxu1  ;;  %1447 = vmatmul.mubr.bf16.gmra.mxu0 %v635_v13 }
 0x1cf   :  { %v565_v21 = vadd.f32 %v1774_v53, %v564_v19  ;;  %v619_v22 = vmax.f32 %v573_v17, 0.0  ;;  %v1236_v17 = vld [vmem:[%s1951_s7 + $0x8] ss:$0 sm:$0xff] }
 0x1d0   :  { %v1408_v23 = vpop.f32.mrf.mxu1 }
 0x1d1   :  { %v617_v20 = vmax.f32 %v565_v21, 0.0  ;;  %v637_v7 = vpack.c.bf16 %v619_v22, %v618_v26  ;;  %v586_v31 = vadd.f32 %v1408_v23, %v1774_v53  ;;  %v1237_v23 = vld [vmem:[%s1951_s7 + $0x9] ss:$0 sm:$0xff] }
 0x1d2   :  { %v577_v27 = vpop.f32.mrf.mxu1 }
 0x1d3   :  { %v636_v0 = vpack.c.bf16 %v617_v20, %v616_v24  ;;  %v578_v29 = vadd.f32 %v1774_v53, %v577_v27  ;;  %v622_v37 = vmax.f32 %v586_v31, 0.0  ;;  %v1239_v31 = vld [vmem:[%s1951_s7 + $0xb] ss:$0 sm:$0xff] }
 0x1d4   :  { %v1409_v28 = vpop.f32.mrf.mxu1 }
 0x1d5   :  { %v589_v30 = vadd.f32 %v1409_v28, %v1774_v53  ;;  %1450 = vmatprep.mubr.bf16.mxu0 %v636_v0  ;;  %v620_v35 = vmax.f32 %v578_v29, 0.0  ;;  %v1238_v0 = vld [vmem:[%s1951_s7 + $0xa] ss:$0 sm:$0xff] }
 0x1d6   :  { %v580_v32 = vpop.f32.mrf.mxu1  ;;  %1451 = vmatmul.mubr.bf16.gmra.mxu0 %v637_v7 }
 0x1d7   :  { %v581_v33 = vadd.f32 %v1774_v53, %v580_v32  ;;  %v623_v34 = vmax.f32 %v589_v30, 0.0  ;;  %v1228_v53 = vld [vmem:[%s1951_s7] ss:$0 sm:$0xff] }
 0x1d9   :  { %v621_v36 = vmax.f32 %v581_v33, 0.0  ;;  %v639_v38 = vpack.c.bf16 %v623_v34, %v622_v37 }
 0x1db   :  { %v638_v16 = vpack.c.bf16 %v621_v36, %v620_v35  ;;  %v1240_v36 = vld [vmem:[%s1951_s7 + $0xc] ss:$0 sm:$0xff] }
 0x1dd   :  { %1454 = vmatprep.mubr.bf16.mxu0 %v638_v16 }
 0x1de   :  { %1455 = vmatmul.mubr.bf16.gmra.mxu0 %v639_v38 }
 0x266   :  { %v1428_v25 = vpop.f32.mrf.mxu0 }
 0x267   :  { %v754_v46 = vadd.f32 %v1428_v25, %v1811_v41 }
 0x268   :  { %v745_v40 = vpop.f32.mrf.mxu0 }
 0x269   :  { %v746_v43 = vadd.f32 %v1811_v41, %v745_v40  ;;  %v1098_v54 = vmul.f32 %v1230_v48, %v754_v46  ;;  %v1241_v40 = vld [vmem:[%s1951_s7 + $0xd] ss:$0 sm:$0xff] }
 0x26a   :  { %v1429_v42 = vpop.f32.mrf.mxu0 }
 0x26b   :  { %v1096_v39 = vmul.f32 %v1228_v53, %v746_v43  ;;  %v757_v50 = vadd.f32 %v1429_v42, %v1811_v41 }
 0x26c   :  { %v748_v44 = vpop.f32.mrf.mxu0 }
 0x26d   :  { %v749_v47 = vadd.f32 %v1811_v41, %v748_v44  ;;  %v1099_v59 = vmul.f32 %v1231_v51, %v757_v50 }
 0x26e   :  { %v1432_v49 = vpop.f32.mrf.mxu0 }
 0x26f   :  { %v1097_v2 = vmul.f32 %v1229_v45, %v749_v47  ;;  %v770_v63 = vadd.f32 %v1432_v49, %v1811_v41  ;;  %v1242_v45 = vld [vmem:[%s1951_s7 + $0xe] ss:$0 sm:$0xff] }
 0x270   :  { %v761_v52 = vpop.f32.mrf.mxu0 }
 0x271   :  { %v1128_v55 = vadd.f32 %v1097_v2, %v1096_v39  ;;  %v762_v56 = vadd.f32 %v1811_v41, %v761_v52  ;;  %v1102_v13 = vmul.f32 %v1234_v5, %v770_v63  ;;  %v1243_v39 = vld [vmem:[%s1951_s7 + $0xf] ss:$0 sm:$0xff] }
 0x272   :  { %v1433_v58 = vpop.f32.mrf.mxu0 }
 0x273   :  { %v1129_v60 = vadd.f32 %v1128_v55, %v1098_v54  ;;  %v1100_v1 = vmul.f32 %v1232_v57, %v762_v56  ;;  %v773_v9 = vadd.f32 %v1433_v58, %v1811_v41  ;;  %v1244_v54 = vld [vmem:[%s1951_s7 + $0x10] ss:$0 sm:$0xff] }
 0x274   :  { %v764_v61 = vpop.f32.mrf.mxu0 }
 0x275   :  { %v1130_v4 = vadd.f32 %v1129_v60, %v1099_v59  ;;  %v765_v3 = vadd.f32 %v1811_v41, %v764_v61  ;;  %v1103_v19 = vmul.f32 %v1235_v11, %v773_v9  ;;  %v1245_v59 = vld [vmem:[%s1951_s7 + $0x11] ss:$0 sm:$0xff] }
 0x276   :  { %v1436_v6 = vpop.f32.mrf.mxu0 }
 0x277   :  { %v1131_v8 = vadd.f32 %v1130_v4, %v1100_v1  ;;  %v1101_v10 = vmul.f32 %v1233_v62, %v765_v3  ;;  %v786_v24 = vadd.f32 %v1436_v6, %v1811_v41  ;;  %v1246_v1 = vld [vmem:[%s1951_s7 + $0x12] ss:$0 sm:$0xff] }
 0x278   :  { %v777_v12 = vpop.f32.mrf.mxu0 }
 0x279   :  { %v1132_v14 = vadd.f32 %v1131_v8, %v1101_v10  ;;  %v778_v15 = vadd.f32 %v1811_v41, %v777_v12  ;;  %v1106_v33 = vmul.f32 %v1238_v0, %v786_v24  ;;  %v1247_v8 = vld [vmem:[%s1951_s7 + $0x13] ss:$0 sm:$0xff] }
 0x27a   :  { %v1437_v18 = vpop.f32.mrf.mxu0 }
 0x27b   :  { %v1133_v21 = vadd.f32 %v1132_v14, %v1102_v13  ;;  %v1104_v20 = vmul.f32 %v1236_v17, %v778_v15  ;;  %v789_v29 = vadd.f32 %v1437_v18, %v1811_v41  ;;  %v1248_v13 = vld [vmem:[%s1951_s7 + $0x14] ss:$0 sm:$0xff] }
 0x27c   :  { %v780_v22 = vpop.f32.mrf.mxu0 }
 0x27d   :  { %v1134_v26 = vadd.f32 %v1133_v21, %v1103_v19  ;;  %v781_v27 = vadd.f32 %v1811_v41, %v780_v22  ;;  %v1107_v16 = vmul.f32 %v1239_v31, %v789_v29  ;;  %v1249_v19 = vld [vmem:[%s1951_s7 + $0x15] ss:$0 sm:$0xff] }
 0x27e   :  { %v1440_v7 = vpop.f32.mrf.mxu0 }
 0x27f   :  { %v1135_v28 = vadd.f32 %v1134_v26, %v1104_v20  ;;  %v1105_v30 = vmul.f32 %v1237_v23, %v781_v27  ;;  %v802_v42 = vadd.f32 %v1440_v7, %v1811_v41  ;;  %v1250_v20 = vld [vmem:[%s1951_s7 + $0x16] ss:$0 sm:$0xff] }
 0x280   :  { %v793_v32 = vpop.f32.mrf.mxu0 }
 0x281   :  { %v1136_v34 = vadd.f32 %v1135_v28, %v1105_v30  ;;  %v794_v35 = vadd.f32 %v1811_v41, %v793_v32  ;;  %v1110_v2 = vmul.f32 %v1242_v45, %v802_v42  ;;  %v1251_v28 = vld [vmem:[%s1951_s7 + $0x17] ss:$0 sm:$0xff] }
 0x282   :  { %v1441_v37 = vpop.f32.mrf.mxu0 }
 0x283   :  { %v1137_v38 = vadd.f32 %v1136_v34, %v1106_v33  ;;  %v1108_v43 = vmul.f32 %v1240_v36, %v794_v35  ;;  %v805_v48 = vadd.f32 %v1441_v37, %v1811_v41  ;;  %v1252_v33 = vld [vmem:[%s1951_s7 + $0x18] ss:$0 sm:$0xff] }
 0x284   :  { %v796_v25 = vpop.f32.mrf.mxu0 }
 0x285   :  { %v1138_v53 = vadd.f32 %v1137_v38, %v1107_v16  ;;  %v797_v44 = vadd.f32 %v1811_v41, %v796_v25  ;;  %v1111_v56 = vmul.f32 %v1243_v39, %v805_v48  ;;  %v1253_v16 = vld [vmem:[%s1951_s7 + $0x19] ss:$0 sm:$0xff] }
 0x286   :  { %v1444_v46 = vpop.f32.mrf.mxu0 }
 0x287   :  { %v1139_v47 = vadd.f32 %v1138_v53, %v1108_v43  ;;  %v1109_v49 = vmul.f32 %v1241_v40, %v797_v44  ;;  %v818_v60 = vadd.f32 %v1444_v46, %v1811_v41  ;;  %v1254_v43 = vld [vmem:[%s1951_s7 + $0x1a] ss:$0 sm:$0xff] }
 0x288   :  { %v809_v50 = vpop.f32.mrf.mxu0 }
 0x289   :  { %v1140_v51 = vadd.f32 %v1139_v47, %v1109_v49  ;;  %v810_v52 = vadd.f32 %v1811_v41, %v809_v50  ;;  %v1114_v10 = vmul.f32 %v1246_v1, %v818_v60  ;;  %v1255_v47 = vld [vmem:[%s1951_s7 + $0x1b] ss:$0 sm:$0xff] }
 0x28a   :  { %v1445_v55 = vpop.f32.mrf.mxu0 }
 0x28b   :  { %v1141_v57 = vadd.f32 %v1140_v51, %v1110_v2  ;;  %v1112_v61 = vmul.f32 %v1244_v54, %v810_v52  ;;  %v821_v5 = vadd.f32 %v1445_v55, %v1811_v41  ;;  %v1256_v2 = vld [vmem:[%s1951_s7 + $0x1c] ss:$0 sm:$0xff] }
 0x28c   :  { %v812_v58 = vpop.f32.mrf.mxu0 }
 0x28d   :  { %v1142_v62 = vadd.f32 %v1141_v57, %v1111_v56  ;;  %v813_v63 = vadd.f32 %v1811_v41, %v812_v58  ;;  %v1115_v15 = vmul.f32 %v1247_v8, %v821_v5  ;;  %v1257_v56 = vld [vmem:[%s1951_s7 + $0x1d] ss:$0 sm:$0xff] }
 0x28e   :  { %v1448_v4 = vpop.f32.mrf.mxu0 }
 0x28f   :  { %v1143_v3 = vadd.f32 %v1142_v62, %v1112_v61  ;;  %v1113_v6 = vmul.f32 %v1245_v59, %v813_v63  ;;  %v834_v21 = vadd.f32 %v1448_v4, %v1811_v41  ;;  %v1258_v61 = vld [vmem:[%s1951_s7 + $0x1e] ss:$0 sm:$0xff]  ;;  %v1259_v4 = vld [vmem:[%s1951_s7 + $0x1f] ss:$0 sm:$0xff]  ;;  %s1507_s7 = smov [#allocation2]  }
 0x290   :  { %v825_v9 = vpop.f32.mrf.mxu0  ;;  %s1183_s6 = sshll.u32 %s1507_s7, 4  ;;  %s1184_s6 = int_to_ptr.vmem [resolvable:$true] %s1183_s6 }
 0x291   :  { %v1144_v11 = vadd.f32 %v1143_v3, %v1113_v6  ;;  %v826_v12 = vadd.f32 %v1811_v41, %v825_v9  ;;  %v1118_v30 = vmul.f32 %v1250_v20, %v834_v21  ;;  %s1485_s18 = scalar_lea.vmem %s1184_s6, 128  ;;  %p1490_p1 = scmp.lt.s32.totalorder %s1184_s6, %s1184_s6 }
 0x292   :  { %v1449_v14 = vpop.f32.mrf.mxu0  ;;  %p1486_p0 = scmp.ne.s32.totalorder %s1184_s6, %s1485_s18  ;;  %p1491_p2 = scmp.lt.s32.totalorder %s1485_s18, %s1485_s18 }
 0x293   :  { %v1145_v17 = vadd.f32 %v1144_v11, %v1114_v10  ;;  %v1116_v22 = vmul.f32 %v1248_v13, %v826_v12  ;;  %v837_v0 = vadd.f32 %v1449_v14, %v1811_v41 }
 0x294   :  { %v828_v18 = vpop.f32.mrf.mxu0  ;;  %p1492_p3 = por %p1491_p2, %p1490_p1 }
 0x295   :  { %v1146_v23 = vadd.f32 %v1145_v17, %v1115_v15  ;;  %v829_v24 = vadd.f32 %v1811_v41, %v828_v18  ;;  %v1119_v35 = vmul.f32 %v1251_v28, %v837_v0 }
 0x296   :  { %v1452_v26 = vpop.f32.mrf.mxu0  ;;  %p1493_p4 = pnand %p1492_p3, %p1486_p0 }
 0x297   :  { %v1147_v27 = vadd.f32 %v1146_v23, %v1116_v22  ;;  %v1117_v7 = vmul.f32 %v1249_v19, %v829_v24  ;;  %v850_v38 = vadd.f32 %v1452_v26, %v1811_v41 }
 0x298   :  { %v841_v29 = vpop.f32.mrf.mxu0 }
 0x299   :  { %v1148_v31 = vadd.f32 %v1147_v27, %v1117_v7  ;;  %v842_v32 = vadd.f32 %v1811_v41, %v841_v29  ;;  %v1122_v49 = vmul.f32 %v1254_v43, %v850_v38 }
 0x29a   :  { %v1453_v34 = vpop.f32.mrf.mxu0 }
 0x29b   :  { %v1149_v36 = vadd.f32 %v1148_v31, %v1118_v30  ;;  %v1120_v25 = vmul.f32 %v1252_v33, %v842_v32  ;;  %v853_v45 = vadd.f32 %v1453_v34, %v1811_v41 }
 0x29c   :  { %v844_v37 = vpop.f32.mrf.mxu0 }
 0x29d   :  { %v1150_v40 = vadd.f32 %v1149_v36, %v1119_v35  ;;  %v845_v42 = vadd.f32 %v1811_v41, %v844_v37  ;;  %v1123_v52 = vmul.f32 %v1255_v47, %v853_v45 }
 0x29e   :  { %v1456_v53 = vpop.f32.mrf.mxu0 }
 0x29f   :  { %v1151_v44 = vadd.f32 %v1150_v40, %v1120_v25  ;;  %v1121_v46 = vmul.f32 %v1253_v16, %v845_v42  ;;  %v866_v57 = vadd.f32 %v1456_v53, %v1811_v41 }
 0x2a0   :  { %v857_v48 = vpop.f32.mrf.mxu0 }
 0x2a1   :  { %v1152_v39 = vadd.f32 %v1151_v44, %v1121_v46  ;;  %v858_v50 = vadd.f32 %v1811_v41, %v857_v48  ;;  %v1126_v3 = vmul.f32 %v1258_v61, %v866_v57 }
 0x2a2   :  { %v1457_v51 = vpop.f32.mrf.mxu0 }
 0x2a3   :  { %v1153_v54 = vadd.f32 %v1152_v39, %v1122_v49  ;;  %v1124_v58 = vmul.f32 %v1256_v2, %v858_v50  ;;  %v869_v63 = vadd.f32 %v1457_v51, %v1811_v41 }
 0x2a4   :  { %v860_v55 = vpop.f32.mrf.mxu0 }
 0x2a5   :  { %v1154_v59 = vadd.f32 %v1153_v54, %v1123_v52  ;;  %v861_v60 = vadd.f32 %v1811_v41, %v860_v55  ;;  %v1127_v6 = vmul.f32 %v1259_v4, %v869_v63 }
 0x2a7   :  { %v1155_v62 = vadd.f32 %v1154_v59, %v1124_v58  ;;  %v1125_v1 = vmul.f32 %v1257_v56, %v861_v60 }
 0x2a9   :  { %v1156_v5 = vadd.f32 %v1155_v62, %v1125_v1 }
 0x2ab   :  { %v1157_v8 = vadd.f32 %v1156_v5, %v1126_v3 }
 0x2ad   :  { %v1158_v9 = vadd.f32 %v1157_v8, %v1127_v6 }
 0x2af   :  { %v1159_v10 = vrot.slane %v1158_v9, 4 }
 0x2b1   :  { %v1160_v11 = vmax.f32 %v1158_v9, %v1159_v10 }
 0x2b3   :  { %v1161_v12 = vrot.slane %v1160_v11, 2 }
 0x2b5   :  { %v1162_v13 = vmax.f32 %v1160_v11, %v1161_v12 }
 0x2b7   :  { %v1163_v14 = vrot.slane %v1162_v13, 1 }
 0x2b9   :  { %v1164_v15 = vmax.f32 %v1162_v13, %v1163_v14 }
 0x2bb   :  { %v1165_v17 = vsub.f32 %v1158_v9, %v1164_v15 }
 0x2bd   :  { %v1166_v18 = vmul.f32 1.442695, %v1165_v17 }
 0x2bf   :  { %1481 = vpow2.f32 %v1166_v18 }
 0x2cc   :  { %v1482_v41 = vpop.eup %1481 }
 0x2cd   :  { %v1168_v19 = vrot.slane %v1482_v41, 4 }
 0x2cf   :  { %v1169_v21 = vadd.f32 %v1482_v41, %v1168_v19 }
 0x2d1   :  { %v1170_v22 = vrot.slane %v1169_v21, 2 }
 0x2d3   :  { %v1171_v23 = vadd.f32 %v1170_v22, %v1169_v21 }
 0x2d5   :  { %v1172_v24 = vrot.slane %v1171_v23, 1 }
 0x2d7   :  { %v1173_v20 = vadd.f32 %v1172_v24, %v1171_v23 }
 0x2d9   :  { %1483 = vrcp.f32 %v1173_v20 }
 0x2e6   :  { %v1484_v26 = vpop.eup %1483 }
 0x2e7   :  { %v1175_v27 = vmul.f32 %v1484_v26, %v1482_v41 }
 0x2e9   :  { %1176 = vst [vmem:[#allocation2] sm:$0xff] %v1175_v27 }
 0x2ea   :  { %1496 = shalt.err (!%p1493_p4)
}
 0x2eb   :  { %1186 = dma.vmem_to_hbm [thread:$0]  %s1184_s6, 128, %s1952_s8, [#allocation3]  }
 0x2ec   :  { %1505 = dma.done.wait [#allocation3], 128  }
 0x2ed   :  { %1506 = vsyncadd [#allocation3], 4294967168 }
 0x2ee   :  { %1190 = vsyncpa [#allocation3], 1 }

</bundles_post_ra>
